<compile_context>
chip_gen: v5e
topology: v5e:2x2
jax: 0.10.0
libtpu: 0.0.40
codegen_flags: <defaults>
</compile_context>

<pallas_src>
import jax
import jax.numpy as jnp
from jax import lax
from jax.experimental import pallas as pl
from jax.experimental.pallas import tpu as pltpu


def git_loss_kernel(x_ref, labels_1b_ref, centers_ref, lr_ref,
                    loss_ref, new_centers_ref):
    x = x_ref[...]                       # (B, D) f32
    labels_1b = labels_1b_ref[...]       # (1, B) i32
    centers = centers_ref[...]           # (C, D) f32
    lr = lr_ref[0, 0]                    # scalar f32 (SMEM)

    B, D = x.shape
    C = centers.shape[0]

    # mask_t[j, i] = (labels[i] == j) — pure-VPU iota compare, (C, B).
    mask_t = (lax.broadcasted_iota(jnp.int32, (C, B), 0) == labels_1b
              ).astype(jnp.float32)                                   # (C, B)

    # ---- center update (vectorized form of the PyTorch double loop) ----
    # delta_j = (count_j * centers[j] - sum_{i: y_i==j} x[i]) / (1 + count_j)
    counts = jnp.sum(mask_t, axis=1, keepdims=True)                   # (C, 1) lane reduce
    sum_x = jnp.dot(mask_t, x, preferred_element_type=jnp.float32)    # (C, D) MXU
    # Exact reciprocal on the small (C,1) shape, then a cheap VALU multiply —
    # do NOT broadcast a multi-op f32 divide across the (C, D) tile.
    inv_cnt = 1.0 / (1.0 + counts)                                    # (C, 1) exact
    delta = (counts * centers - sum_x) * inv_cnt                      # (C, D)
    new_centers = centers - lr * delta                                # (C, D)
    new_centers_ref[...] = new_centers

    # ---- squared distances in (C, B) orientation: ||x_i - c_j||^2 ----
    # x_sq depends only on x, so its tiny MXU matmul is issued/popped before
    # cross_t (which waits on new_centers): nothing queues behind cross_t in
    # the MXU result FIFO on v5e/v6e.
    x_sq = lax.dot_general(
        jnp.ones((1, D), jnp.float32), x * x,
        dimension_numbers=(((1,), (1,)), ((), ())),
        preferred_element_type=jnp.float32)                           # (1, B)
    # c_sq stays (C, 1): XLU lane reduce, NOT a ones-vector MXU matmul.
    c_sq = jnp.sum(new_centers * new_centers, axis=1, keepdims=True)  # (C, 1)
    cross_t = lax.dot_general(
        new_centers, x,
        dimension_numbers=(((1,), (1,)), ((), ())),
        preferred_element_type=jnp.float32)                           # (C, B) MXU
    distmat_t = x_sq + c_sq - 2.0 * cross_t                           # (C, B)

    # Exact reciprocal on the loss path (EUP); approx is not worth the error
    # at this size.
    inv = pl.reciprocal(1.0 + distmat_t, approx=False)                # (C, B)

    # Per-sample sum over non-target classes (sublane reduce), clamp, mean.
    value = jnp.sum(inv * (1.0 - mask_t), axis=0, keepdims=True)      # (1, B)
    value = jnp.clip(value, 1e-12, 1e12)
    loss_ref[0, 0] = jnp.sum(value) * (1.0 / B)                       # scalar → SMEM


def git_loss(x, labels, centers, lr):
    B, D = x.shape
    C, _ = centers.shape
    labels_1b = labels.astype(jnp.int32).reshape(1, B)
    lr2d = jnp.asarray(lr, jnp.float32).reshape(1, 1)

    # Advisory hint: the kernel is tiny and latency-bound; telling XLA so lets
    # the scheduler overlap this custom call with neighboring HLOs.
    cost = pl.CostEstimate(
        flops=4 * C * B * D + 8 * C * D + 6 * C * B + 2 * B * D,
        transcendentals=C * B + C,
        bytes_accessed=4 * (B * D + 2 * C * D + B + 1),
    )

    loss, new_centers = pl.pallas_call(
        git_loss_kernel,
        out_shape=(
            jax.ShapeDtypeStruct((1, 1), jnp.float32),   # loss (scalar)
            jax.ShapeDtypeStruct((C, D), jnp.float32),   # updated centers
        ),
        in_specs=[
            pl.BlockSpec(memory_space=pltpu.MemorySpace.VMEM),  # x
            pl.BlockSpec(memory_space=pltpu.MemorySpace.VMEM),  # labels (1,B)
            pl.BlockSpec(memory_space=pltpu.MemorySpace.VMEM),  # centers
            pl.BlockSpec(memory_space=pltpu.MemorySpace.SMEM),  # lr (1,1)
        ],
        out_specs=(
            pl.BlockSpec(memory_space=pltpu.MemorySpace.SMEM),  # scalar loss
            pl.BlockSpec(memory_space=pltpu.MemorySpace.VMEM),  # new centers
        ),
        cost_estimate=cost,
    )(x, labels_1b, centers, lr2d)
    return loss[0, 0], new_centers


def git_loss_ref(x, labels, centers, lr):
    """Pure-JAX reference mirroring the PyTorch forward (loss + updated centers)."""
    B, D = x.shape
    C = centers.shape[0]
    onehot = (labels[:, None] == jnp.arange(C)[None, :]).astype(jnp.float32)
    counts = onehot.sum(0)                                    # (C,)
    sum_x = onehot.T @ x                                      # (C, D)
    delta = (counts[:, None] * centers - sum_x) / (1.0 + counts[:, None])
    nc = centers - lr * delta
    d = (x ** 2).sum(1, keepdims=True) + (nc ** 2).sum(1)[None, :] - 2.0 * (x @ nc.T)
    d = 1.0 / (1.0 + d)
    row = d.sum(1)
    tgt = (d * onehot).sum(1)
    val = jnp.clip(row - tgt, 1e-12, 1e12)
    return val.mean(), nc


if __name__ == "__main__":
    # Small shapes consistent with the module: x (B, feat_dim), labels (B,),
    # centers (num_classes, feat_dim), lr scalar parameter = 0.1.
    B, D, C = 8, 128, 16

    key = jax.random.PRNGKey(0)
    kx, kc, kl = jax.random.split(key, 3)
    x = jax.random.normal(kx, (B, D), jnp.float32)
    centers = jax.random.normal(kc, (C, D), jnp.float32)   # deterministic randn init
    labels = jax.random.randint(kl, (B,), 0, C, jnp.int32)
    lr = jnp.float32(0.1)

    loss, new_centers = git_loss(x, labels, centers, lr)
    loss = jax.block_until_ready(loss)
    new_centers = jax.block_until_ready(new_centers)

    ref_loss, ref_centers = git_loss_ref(x, labels, centers, lr)
    # Exact reciprocal on the loss path now; tolerance only absorbs f32 MXU
    # pass-precision / reduction-order differences.
    assert jnp.allclose(loss, ref_loss, rtol=1e-3, atol=1e-6), (loss, ref_loss)
    assert jnp.allclose(new_centers, ref_centers, rtol=1e-5, atol=1e-5)

    print("KERNEL_OK")
</pallas_src>

<mosaic_0001>
module attributes {stable_mosaic.version = 11 : i64} {
  func.func @git_loss_kernel(%arg0: memref<8x128xf32, #tpu.memory_space<vmem>>, %arg1: memref<1x8xi32, #tpu.memory_space<vmem>>, %arg2: memref<16x128xf32, #tpu.memory_space<vmem>>, %arg3: memref<1x1xf32, #tpu.memory_space<smem>>, %arg4: memref<1x1xf32, #tpu.memory_space<smem>>, %arg5: memref<16x128xf32, #tpu.memory_space<vmem>>) attributes {dimension_semantics = [], scalar_prefetch = 0 : i64, scratch_operands = 0 : i64, tpu.core_type = #tpu.core_type<tc>} {
    %c0 = arith.constant 0 : index
    %c0_0 = arith.constant 0 : index
    %0 = vector.load %arg0[%c0, %c0_0] : memref<8x128xf32, #tpu.memory_space<vmem>>, vector<8x128xf32>
    %c0_1 = arith.constant 0 : index
    %c0_2 = arith.constant 0 : index
    %1 = vector.load %arg1[%c0_1, %c0_2] : memref<1x8xi32, #tpu.memory_space<vmem>>, vector<1x8xi32>
    %c0_3 = arith.constant 0 : index
    %c0_4 = arith.constant 0 : index
    %2 = vector.load %arg2[%c0_3, %c0_4] : memref<16x128xf32, #tpu.memory_space<vmem>>, vector<16x128xf32>
    %c0_5 = arith.constant 0 : index
    %c0_6 = arith.constant 0 : index
    %3 = memref.load %arg3[%c0_5, %c0_6] : memref<1x1xf32, #tpu.memory_space<smem>>
    %4 = tpu.iota {dimensions = array<i32: 0>} : vector<16x8xi32>
    %5 = vector.broadcast %1 : vector<1x8xi32> to vector<16x8xi32>
    %6 = arith.cmpi eq, %4, %5 : vector<16x8xi32>
    %7 = arith.extui %6 : vector<16x8xi1> to vector<16x8xi32>
    %8 = arith.sitofp %7 : vector<16x8xi32> to vector<16x8xf32>
    %cst = arith.constant dense<0.000000e+00> : vector<16xf32>
    %9 = vector.multi_reduction <add>, %8, %cst [1] : vector<16x8xf32> to vector<16xf32>
    %10 = vector.shape_cast %9 : vector<16xf32> to vector<16x1xf32>
    %cst_7 = arith.constant dense<0.000000e+00> : vector<16x128xf32>
    %11 = tpu.matmul %8, %0, %cst_7 {dimension_numbers = #tpu.dot_dimension_numbers<[1], [0], [0], [1], [0, 0, 1, 1], [], []>} : vector<16x8xf32>, vector<8x128xf32>, vector<16x128xf32> -> vector<16x128xf32>
    %cst_8 = arith.constant 1.000000e+00 : f32
    %12 = vector.broadcast %cst_8 : f32 to vector<16x1xf32>
    %13 = arith.addf %12, %10 : vector<16x1xf32>
    %cst_9 = arith.constant 1.000000e+00 : f32
    %14 = vector.broadcast %cst_9 : f32 to vector<16x1xf32>
    %15 = arith.divf %14, %13 : vector<16x1xf32>
    %16 = vector.broadcast %10 : vector<16x1xf32> to vector<16x128xf32>
    %17 = arith.mulf %16, %2 : vector<16x128xf32>
    %18 = arith.subf %17, %11 : vector<16x128xf32>
    %19 = vector.broadcast %15 : vector<16x1xf32> to vector<16x128xf32>
    %20 = arith.mulf %18, %19 : vector<16x128xf32>
    %21 = vector.broadcast %3 : f32 to vector<16x128xf32>
    %22 = arith.mulf %21, %20 : vector<16x128xf32>
    %23 = arith.subf %2, %22 : vector<16x128xf32>
    %c0_10 = arith.constant 0 : index
    %c0_11 = arith.constant 0 : index
    %24 = vector.load %arg5[%c0_10, %c0_11] : memref<16x128xf32, #tpu.memory_space<vmem>>, vector<16x128xf32>
    tpu.vector_store %arg5[%c0_10, %c0_11], %23 {strides = array<i32>} : memref<16x128xf32, #tpu.memory_space<vmem>>, vector<16x128xf32>,
    %cst_12 = arith.constant 1.000000e+00 : f32
    %25 = vector.broadcast %cst_12 : f32 to vector<1x128xf32>
    %26 = arith.mulf %0, %0 : vector<8x128xf32>
    %cst_13 = arith.constant dense<0.000000e+00> : vector<1x8xf32>
    %27 = tpu.matmul %25, %26, %cst_13 {dimension_numbers = #tpu.dot_dimension_numbers<[1], [1], [0], [0], [0, 0, 1, 0], [], []>} : vector<1x128xf32>, vector<8x128xf32>, vector<1x8xf32> -> vector<1x8xf32>
    %28 = arith.mulf %23, %23 : vector<16x128xf32>
    %cst_14 = arith.constant dense<0.000000e+00> : vector<16xf32>
    %29 = vector.multi_reduction <add>, %28, %cst_14 [1] : vector<16x128xf32> to vector<16xf32>
    %30 = vector.shape_cast %29 : vector<16xf32> to vector<16x1xf32>
    %cst_15 = arith.constant dense<0.000000e+00> : vector<16x8xf32>
    %31 = tpu.matmul %23, %0, %cst_15 {dimension_numbers = #tpu.dot_dimension_numbers<[1], [1], [0], [0], [0, 0, 1, 0], [], []>} : vector<16x128xf32>, vector<8x128xf32>, vector<16x8xf32> -> vector<16x8xf32>
    %32 = vector.broadcast %27 : vector<1x8xf32> to vector<16x8xf32>
    %33 = vector.broadcast %30 : vector<16x1xf32> to vector<16x8xf32>
    %34 = arith.addf %32, %33 : vector<16x8xf32>
    %cst_16 = arith.constant 2.000000e+00 : f32
    %35 = vector.broadcast %cst_16 : f32 to vector<16x8xf32>
    %36 = arith.mulf %35, %31 : vector<16x8xf32>
    %37 = arith.subf %34, %36 : vector<16x8xf32>
    %cst_17 = arith.constant 1.000000e+00 : f32
    %38 = vector.broadcast %cst_17 : f32 to vector<16x8xf32>
    %39 = arith.addf %38, %37 : vector<16x8xf32>
    %40 = tpu.reciprocal %39 : vector<16x8xf32> -> vector<16x8xf32>
    %cst_18 = arith.constant 1.000000e+00 : f32
    %41 = vector.broadcast %cst_18 : f32 to vector<16x8xf32>
    %42 = arith.subf %41, %8 : vector<16x8xf32>
    %43 = arith.mulf %40, %42 : vector<16x8xf32>
    %cst_19 = arith.constant dense<0.000000e+00> : vector<8xf32>
    %44 = vector.multi_reduction <add>, %43, %cst_19 [0] : vector<16x8xf32> to vector<8xf32>
    %45 = vector.shape_cast %44 : vector<8xf32> to vector<1x8xf32>
    %cst_20 = arith.constant 9.99999996E-13 : f32
    %cst_21 = arith.constant 9.99999995E+11 : f32
    %46 = vector.broadcast %cst_20 : f32 to vector<1x8xf32>
    %47 = arith.maximumf %46, %45 : vector<1x8xf32>
    %48 = vector.broadcast %cst_21 : f32 to vector<1x8xf32>
    %49 = arith.minimumf %48, %47 : vector<1x8xf32>
    %50 = vector.shape_cast %49 : vector<1x8xf32> to vector<1x1x8xf32>
    %cst_22 = arith.constant dense<0.000000e+00> : vector<1xf32>
    %51 = vector.multi_reduction <add>, %50, %cst_22 [1, 2] : vector<1x1x8xf32> to vector<1xf32>
    %52 = vector.shape_cast %51 : vector<1xf32> to vector<1x1x1xf32>
    %53 = vector.extract %52[0, 0, 0] : f32 from vector<1x1x1xf32>
    %cst_23 = arith.constant 1.250000e-01 : f32
    %54 = arith.mulf %53, %cst_23 : f32
    %c0_24 = arith.constant 0 : index
    %c0_25 = arith.constant 0 : index
    %55 = memref.load %arg4[%c0_24, %c0_25] : memref<1x1xf32, #tpu.memory_space<smem>>
    memref.store %54, %arg4[%c0_24, %c0_25] : memref<1x1xf32, #tpu.memory_space<smem>>
    return
  }
}

</mosaic_0001>

<bundles_post_ra>
// kernel: tpu_custom_call.1
= control target key start
LH: loop header
LB: loop body
LE: loop exit
PB: predicated region body
PF: predicated region fallthrough
CT: control target
= control target key end

     0   :  { %12 = vsyncpa [#allocation4], 0  ;;  %s493_s0 = inlined_call_operand.hbm [shape: f32[8,128], index: 0, kind: input, shape index: {}]   ;;  %s494_s1 = inlined_call_operand.vmem [shape: s32[1,8], index: 1, kind: input, shape index: {}]   ;;  %s495_s2 = inlined_call_operand.hbm [shape: f32[16,128], index: 2, kind: input, shape index: {}]   ;;  %s496_s3 = inlined_call_operand.<no memory space> [shape: f32[1,1], index: 3, kind: input, shape index: {}]   ;;  %s497_s4 = inlined_call_operand.hbm [shape: f32[1,1], index: 4, kind: output, shape index: {0}]   ;;  %s498_s5 = inlined_call_operand.hbm [shape: f32[16,128], index: 5, kind: output, shape index: {1}]  }
   0x1   :  { %13 = vsyncpa [#allocation8], 0 }
   0x2   :  { %14 = vsyncpa [#allocation6], 0 }
   0x3   :  { %15 = vsyncpa [#allocation5], 0  ;;  %s21_s20 = sshll.u32 %s493_s0, 4  ;;  %s415_s21 = smov [#allocation3]   ;;  %s22_s20 = int_to_ptr.hbm [resolvable:$true] %s21_s20 }
   0x4   :  { %s23_s22 = sshll.u32 %s415_s21, 4  ;;  %s33_s25 = sshll.u32 %s495_s2, 4  ;;  %s24_s22 = int_to_ptr.vmem [resolvable:$true] %s23_s22  ;;  %s34_s25 = int_to_ptr.hbm [resolvable:$true] %s33_s25 }
   0x5   :  { %26 = dma.hbm_to_vmem [thread:$0]  %s22_s20, 128, %s24_s22, [#allocation4]  }
   0x6   :  { %s416_s26 = smov [#allocation7]   ;;  %s417_s28 = smov 128  }
   0x7   :  { %s35_s27 = sshll.u32 %s416_s26, 4  ;;  %s418_s29 = smov 8   ;;  %s36_s27 = int_to_ptr.vmem [resolvable:$true] %s35_s27 }
   0x8   :  { %41 = dma.hbm_to_vmem [thread:$0]  %s34_s25, 256, %s36_s27, [#allocation8], %s417_s28, %s417_s28, %s418_s29  }
   0x9   :  { %407 = dma.done.wait [#allocation4], 128  }
   0xa   :  { %408 = vsyncadd [#allocation4], 4294967168 }
   0xb   :  { %409 = dma.done.wait [#allocation8], 256  }
   0xc   :  { %410 = vsyncadd [#allocation8], 4294967040  ;;  %v57_v0 = vlaneseq  ;;  %v52_v2 = vld [vmem:[#allocation3] sm:$0xff]  ;;  %vm67_vm0 = vcmask 64512   ;;  %v419_v5 = vmov 0.0   ;;  %v420_v11 = vmov 1.0  }
   0xd   :  { %v314_v3 = vld [vmem:[%s494_s1] ss:$0 sm:$0xff]  ;;  %95 = vmatpush.msra.mxu0 %v52_v2  ;;  %190 = vmatpush.xpose.msra.mxu2 %v52_v2  ;;  %v148_v10 = vmul.f32 %v52_v2, %v52_v2  ;;  %v54_v19 = vld [vmem:[#allocation7] sm:$0xff]  ;;  %v141_v32 = vstv %s496_s3  ;;  %v55_v35 = vld [vmem:[#allocation7 + $0x8] sm:$0xff]  ;;  %s421_s3 = smov [#allocation10]   ;;  %s279_s9 = sshll.u32 %s498_s5, 4  ;;  %s280_s9 = int_to_ptr.hbm [resolvable:$true] %s279_s9 }
   0xe   :  { %v58_v1 = vshrl.u32 %v57_v0, 7  ;;  %303 = vmatpush.xpose.msra.mxu3 %v52_v2  ;;  %s277_s6 = sshll.u32 %s421_s3, 4  ;;  %s269_s12 = sshll.u32 %s497_s4, 4  ;;  %s278_s6 = int_to_ptr.vmem [resolvable:$true] %s277_s6  ;;  %s270_s12 = int_to_ptr.hbm [resolvable:$true] %s269_s12 }
   0xf   :  { %164 = vmatpush.xpose.msra.mxu1 %v148_v10  ;;  %s422_s14 = smov [#allocation9]  }
  0x10   :  { %v59_v4 = vadd.s32 8, %v58_v1  ;;  %vm61_vm1 = vcmp.eq.s32.totalorder %v58_v1, %v314_v3 }
  0x11   :  { %v465_v6 = vsel %vm61_vm1, 1.0, %v419_v5 }
  0x12   :  { %301 = vmatmul.msk.f32.vlgmr.msra.gmra.mxu0 %vm67_vm0, %v465_v6  ;;  %v68_v7 = vsel %vm67_vm0, %v465_v6, 0.0  ;;  %vm62_vm2 = vcmp.eq.s32.totalorder %v59_v4, %v314_v3  ;;  %165 = vmatmul.f32.vlgmr.msra.gmra.mxu1 %v420_v11 }
  0x13   :  { %69 = vadd.xlane.f32.xlu0 %v68_v7  ;;  %v471_v8 = vsel %vm62_vm2, 1.0, %v419_v5 }
  0x14   :  { %v71_v9 = vsel %vm67_vm0, %v471_v8, 0.0 }
  0x1a   :  { %302 = vmatmul.msk.f32.gmra.mxu0 %vm67_vm0, %v471_v8 }
  0x1b   :  { %72 = vadd.xlane.f32.xlu0 %v71_v9 }
  0x86   :  { %v70_v12 = vpop.xlane.xlu0 %69 }
  0x87   :  { %v103_v13 = vadd.f32 1.0, %v70_v12  ;;  %v135_v24 = vmul.f32 %v70_v12, %v54_v19 }
  0x89   :  { %315 = vrcp.f32 %v103_v13  ;;  %v116_v21 = vand.u32 2147483648, %v103_v13  ;;  %v114_v23 = vand.u32 2147483647, %v103_v13  ;;  %vm110_vm4 = vweird.f32 %v103_v13 }
  0x8b   :  { %v117_v27 = vor.u32 1.1754944e-38, %v116_v21  ;;  %vm115_vm6 = vcmp.eq.f32.partialorder %v114_v23, 8.507059e+37 }
  0x8e   :  { %v73_v14 = vpop.xlane.xlu0 %72 }
  0x8f   :  { %v316_v15 = vpop.eup %315  ;;  %v104_v16 = vadd.f32 1.0, %v73_v14  ;;  %v97_v20 = vpop.f32.mrf.mxu0  ;;  %v136_v41 = vmul.f32 %v73_v14, %v55_v35 }
  0x90   :  { %v106_v17 = vmul.f32 %v316_v15, %v103_v13  ;;  %vm111_vm3 = vweird.f32 %v316_v15  ;;  %v137_v30 = vsub.f32 %v135_v24, %v97_v20  ;;  %v166_v53 = vpop.f32.mrf.mxu1 }
  0x91   :  { %317 = vrcp.f32 %v104_v16  ;;  %vm112_vm5 = vmor %vm110_vm4, %vm111_vm3  ;;  %v131_v36 = vand.u32 2147483648, %v104_v16  ;;  %v129_v39 = vand.u32 2147483647, %v104_v16  ;;  %vm125_vm8 = vweird.f32 %v104_v16 }
  0x92   :  { %v107_v18 = vsub.f32 1.0, %v106_v17  ;;  %v198_v55 = vperm.slane %v166_v53, 0  ;;  %vm250_vm4 = vcmask 57344  }
  0x93   :  { %v132_v44 = vor.u32 1.1754944e-38, %v131_v36  ;;  %vm130_vm10 = vcmp.eq.f32.partialorder %v129_v39, 8.507059e+37 }
  0x94   :  { %v108_v22 = vmul.f32 %v316_v15, %v107_v18 }
  0x96   :  { %v109_v25 = vadd.f32 %v316_v15, %v108_v22  ;;  %v236_v22 = vsub.f32 1.0, %v471_v8 }
  0x97   :  { %v318_v26 = vpop.eup %317  ;;  %v100_v40 = vpop.f32.mrf.mxu0 }
  0x98   :  { %v121_v28 = vmul.f32 %v318_v26, %v104_v16  ;;  %v113_v29 = vsel %vm112_vm5, %v316_v15, %v109_v25  ;;  %vm126_vm7 = vweird.f32 %v318_v26  ;;  %v138_v46 = vsub.f32 %v136_v41, %v100_v40 }
  0x99   :  { %v118_v31 = vsel %vm115_vm6, %v117_v27, %v113_v29  ;;  %vm127_vm9 = vmor %vm125_vm8, %vm126_vm7  ;;  %v235_v16 = vsub.f32 1.0, %v465_v6 }
  0x9a   :  { %v122_v33 = vsub.f32 1.0, %v121_v28  ;;  %v139_v34 = vmul.f32 %v137_v30, %v118_v31 }
  0x9c   :  { %v142_v37 = vmul.f32 %v141_v32, %v139_v34  ;;  %v123_v38 = vmul.f32 %v318_v26, %v122_v33 }
  0x9e   :  { %v124_v42 = vadd.f32 %v318_v26, %v123_v38  ;;  %v144_v43 = vsub.f32 %v54_v19, %v142_v37 }
  0xa0   :  { %v128_v45 = vsel %vm127_vm9, %v318_v26, %v124_v42  ;;  %191 = vmatmul.f32.vlgmr.msra.gmra.mxu2 %v144_v43  ;;  %146 = vst [vmem:[#allocation10] sm:$0xff] %v144_v43  ;;  %v169_v47 = vmul.f32 %v144_v43, %v144_v43 }
  0xa1   :  { %v133_v48 = vsel %vm130_vm10, %v132_v44, %v128_v45 }
  0xa2   :  { %v140_v49 = vmul.f32 %v138_v46, %v133_v48  ;;  %171 = vadd.xlane.f32.xlu1 %v169_v47 }
  0xa4   :  { %v143_v50 = vmul.f32 %v141_v32, %v140_v49 }
  0xa6   :  { %v145_v51 = vsub.f32 %v55_v35, %v143_v50 }
  0xa8   :  { %194 = vmatmul.f32.vlgmr.msra.gmra.mxu3 %v145_v51  ;;  %147 = vst [vmem:[#allocation10 + $0x8] sm:$0xff] %v145_v51  ;;  %v170_v52 = vmul.f32 %v145_v51, %v145_v51 }
  0xa9   :  { %285 = dma.vmem_to_hbm [thread:$0]  %s278_s6, 256, %s280_s9, [#allocation5], %s417_s28, %s417_s28, %s418_s29  }
  0xaa   :  { %173 = vadd.xlane.f32.xlu1 %v170_v52 }
 0x115   :  { %v172_v54 = vpop.xlane.xlu1 %171 }
 0x116   :  { %v199_v57 = vadd.f32 %v198_v55, %v172_v54 }
 0x11d   :  { %v174_v61 = vpop.xlane.xlu1 %173 }
 0x11e   :  { %v200_v63 = vadd.f32 %v198_v55, %v174_v61 }
 0x123   :  { %v192_v56 = vpop.f32.mrf.mxu2 }
 0x124   :  { %v201_v58 = vmul.f32 2.0, %v192_v56 }
 0x126   :  { %v203_v59 = vsub.f32 %v199_v57, %v201_v58 }
 0x128   :  { %v205_v60 = vadd.f32 1.0, %v203_v59 }
 0x12a   :  { %319 = vrcp.f32 %v205_v60  ;;  %v218_v11 = vand.u32 2147483648, %v205_v60  ;;  %vm212_vm12 = vweird.f32 %v205_v60  ;;  %v216_v12 = vand.u32 2147483647, %v205_v60 }
 0x12b   :  { %v195_v62 = vpop.f32.mrf.mxu3 }
 0x12c   :  { %v202_v0 = vmul.f32 2.0, %v195_v62  ;;  %v219_v17 = vor.u32 1.1754944e-38, %v218_v11  ;;  %vm217_vm15 = vcmp.eq.f32.partialorder %v216_v12, 8.507059e+37 }
 0x12e   :  { %v204_v1 = vsub.f32 %v200_v63, %v202_v0 }
 0x130   :  { %v320_v2 = vpop.eup %319  ;;  %v206_v3 = vadd.f32 1.0, %v204_v1 }
 0x131   :  { %v208_v4 = vmul.f32 %v320_v2, %v205_v60  ;;  %vm213_vm11 = vweird.f32 %v320_v2 }
 0x132   :  { %321 = vrcp.f32 %v206_v3  ;;  %vm214_vm13 = vmor %vm212_vm12, %vm213_vm11  ;;  %v232_v18 = vand.u32 2147483648, %v206_v3  ;;  %v230_v20 = vand.u32 2147483647, %v206_v3  ;;  %vm226_vm1 = vweird.f32 %v206_v3 }
 0x133   :  { %v209_v5 = vsub.f32 1.0, %v208_v4 }
 0x134   :  { %v233_v24 = vor.u32 1.1754944e-38, %v232_v18  ;;  %vm231_vm3 = vcmp.eq.f32.partialorder %v230_v20, 8.507059e+37 }
 0x135   :  { %v210_v7 = vmul.f32 %v320_v2, %v209_v5 }
 0x137   :  { %v211_v9 = vadd.f32 %v320_v2, %v210_v7 }
 0x138   :  { %v322_v10 = vpop.eup %321 }
 0x139   :  { %v222_v13 = vmul.f32 %v322_v10, %v206_v3  ;;  %v215_v15 = vsel %vm214_vm13, %v320_v2, %v211_v9  ;;  %vm227_vm14 = vweird.f32 %v322_v10 }
 0x13a   :  { %v220_v21 = vsel %vm217_vm15, %v219_v17, %v215_v15  ;;  %vm228_vm2 = vmor %vm226_vm1, %vm227_vm14 }
 0x13b   :  { %v223_v14 = vsub.f32 1.0, %v222_v13  ;;  %v237_v26 = vmul.f32 %v235_v16, %v220_v21 }
 0x13d   :  { %v224_v19 = vmul.f32 %v322_v10, %v223_v14  ;;  %v239_v6 = vsel %vm67_vm0, %v237_v26, 0.0 }
 0x13f   :  { %v225_v23 = vadd.f32 %v322_v10, %v224_v19 }
 0x141   :  { %v229_v25 = vsel %vm228_vm2, %v322_v10, %v225_v23 }
 0x142   :  { %v234_v27 = vsel %vm231_vm3, %v233_v24, %v229_v25 }
 0x143   :  { %v238_v28 = vmul.f32 %v236_v22, %v234_v27 }
 0x145   :  { %v240_v29 = vsel %vm67_vm0, %v238_v28, 0.0 }
 0x146   :  { %v241_v30 = vadd.f32 %v240_v29, %v239_v6 }
 0x148   :  { %v242_v31 = vrot.slane %v241_v30, 4 }
 0x14a   :  { %v243_v32 = vadd.f32 %v242_v31, %v241_v30 }
 0x14c   :  { %v244_v33 = vrot.slane %v243_v32, 2 }
 0x14e   :  { %v245_v34 = vadd.f32 %v244_v33, %v243_v32 }
 0x150   :  { %v246_v35 = vrot.slane %v245_v34, 1 }
 0x152   :  { %v247_v8 = vadd.f32 %v246_v35, %v245_v34 }
 0x154   :  { %v248_v36 = vmax.f32 %v247_v8, 1e-12 }
 0x156   :  { %v249_v37 = vmin.f32 %v248_v36, 1e+12 }
 0x158   :  { %v251_v38 = vsel %vm250_vm4, %v249_v37, 0.0 }
 0x159   :  { %252 = vadd.xlane.f32.xlu2 %v251_v38 }
 0x1cc   :  { %v253_v39 = vpop.xlane.xlu2 %252 }
 0x1cd   :  { %v254_v40 = vrot.slane %v253_v39, 4 }
 0x1cf   :  { %v255_v41 = vadd.f32 %v254_v40, %v253_v39 }
 0x1d1   :  { %v256_v42 = vrot.slane %v255_v41, 2 }
 0x1d3   :  { %v257_v43 = vadd.f32 %v256_v42, %v255_v41 }
 0x1d5   :  { %v258_v44 = vrot.slane %v257_v43, 1 }
 0x1d7   :  { %v259_v45 = vadd.f32 %v258_v44, %v257_v43 }
 0x1d9   :  { %304 = vpush %v259_v45 }
 0x20a   :  { %s305_s13 = spop %304 }
 0x20b   :  { %s261_s5 = smul.f32 0.125, %s305_s13 }
 0x20d   :  { %263 = sst [smem:[#allocation9]] %s261_s5 }
 0x20e   :  { %272 = dma.smem_to_hbm %s422_s14, 16, %s270_s12, [#allocation6]  }
 0x20f   :  { %411 = dma.done.wait [#allocation6], 16  }
 0x210   :  { %412 = vsyncadd [#allocation6], 4294967280 }
 0x211   :  { %413 = dma.done.wait [#allocation5], 256  }
 0x212   :  { %414 = vsyncadd [#allocation5], 4294967040 }
 0x213   :  { %294 = sfence }
 0x214   :  { %295 = vsyncpa [#allocation4], 1 }
 0x215   :  { %296 = vsyncpa [#allocation8], 1 }
 0x216   :  { %297 = vsyncpa [#allocation5], 1 }
 0x217   :  { %298 = vsyncpa [#allocation6], 1 }

</bundles_post_ra>
